<compile_context>
chip_gen: v5e
topology: v5e:2x2
jax: 0.10.0
libtpu: 0.0.40
codegen_flags: <defaults>
</compile_context>

<pallas_src>
import jax
import jax.numpy as jnp
from jax import lax
from jax.experimental import pallas as pl
from jax.experimental.pallas import tpu as pltpu

N_FEATURES = 4
OUT_FEATURES = 20

TJ_MAX = 256   # multiple of 8   (sublane-aligned)
TK_MAX = 512   # multiple of 128 (lane-dense output stores, no vst.msk)


def mykernel_body(x_ref, y_ref, w_ref, b_ref, o_ref):
    # dense projections in f32 (tiny: contraction depth F=4, width 20)
    xh = jnp.dot(x_ref[...], w_ref[...], preferred_element_type=jnp.float32) + b_ref[...]
    yh = jnp.dot(y_ref[...], w_ref[...], preferred_element_type=jnp.float32) + b_ref[...]
    # outer-product matmul: bf16 MXU operands, f32 accumulator, contract last dims
    # of both operands directly -> no explicit transpose of yh.
    o_ref[...] = lax.dot_general(
        xh.astype(jnp.bfloat16),
        yh.astype(jnp.bfloat16),
        dimension_numbers=(((1,), (1,)), ((), ())),
        preferred_element_type=jnp.float32,
    )


def _pick_tile(dim, max_tile):
    # Full-dim block if it already fits (always layout-legal); otherwise the
    # aligned max tile, with partial edge blocks handled by Pallas masking.
    return dim if dim <= max_tile else max_tile


def mykernel(x, y, weight, bias):
    """x: (J, F), y: (K, F), weight: (20, F) [PyTorch layout], bias: (20,)."""
    J, F = x.shape
    K, _ = y.shape
    w_t = weight.T.astype(jnp.float32)                        # (F, 20)
    b2 = bias.reshape(1, OUT_FEATURES).astype(jnp.float32)    # (1, 20)

    tj = _pick_tile(J, TJ_MAX)
    tk = _pick_tile(K, TK_MAX)
    grid = (pl.cdiv(J, tj), pl.cdiv(K, tk))

    return pl.pallas_call(
        mykernel_body,
        out_shape=jax.ShapeDtypeStruct((J, K), jnp.float32),
        grid_spec=pltpu.PrefetchScalarGridSpec(
            num_scalar_prefetch=0,
            grid=grid,
            in_specs=[
                pl.BlockSpec((tj, F), lambda i, j: (i, 0)),              # x tile
                pl.BlockSpec((tk, F), lambda i, j: (j, 0)),              # y tile
                pl.BlockSpec((F, OUT_FEATURES), lambda i, j: (0, 0)),    # W^T (broadcast)
                pl.BlockSpec((1, OUT_FEATURES), lambda i, j: (0, 0)),    # bias (broadcast)
            ],
            out_specs=pl.BlockSpec((tj, tk), lambda i, j: (i, j)),
        ),
        compiler_params=pltpu.CompilerParams(
            dimension_semantics=("parallel", "parallel"),
            vmem_limit_bytes=32 * 1024 * 1024,
        ),
    )(x.astype(jnp.float32), y.astype(jnp.float32), w_t, b2)


def _reference(x, y, weight, bias):
    xh = x @ weight.T + bias
    yh = y @ weight.T + bias
    return xh @ yh.T


if __name__ == "__main__":
    key = jax.random.PRNGKey(0)
    kx, ky, kw, kb = jax.random.split(key, 4)

    # nn.Linear(4, 20)-style parameters: uniform in [-1/sqrt(F), 1/sqrt(F)].
    bound = 1.0 / jnp.sqrt(jnp.float32(N_FEATURES))
    weight = jax.random.uniform(kw, (OUT_FEATURES, N_FEATURES),
                                minval=-bound, maxval=bound, dtype=jnp.float32)
    bias = jax.random.uniform(kb, (OUT_FEATURES,),
                              minval=-bound, maxval=bound, dtype=jnp.float32)

    # 1) tiny case matching the module's toy scale (single full-array block)
    J, K = 8, 8
    x = jax.random.normal(kx, (J, N_FEATURES), dtype=jnp.float32)
    y = jax.random.normal(ky, (K, N_FEATURES), dtype=jnp.float32)
    out = mykernel(x, y, weight, bias)
    jax.block_until_ready(out)
    ref = _reference(x, y, weight, bias)
    assert out.shape == (J, K)
    assert jnp.allclose(out, ref, atol=1e-1, rtol=2e-2), float(jnp.max(jnp.abs(out - ref)))

    # 2) multi-tile case with partial edge blocks (exercises the 2-D grid + masking)
    J2, K2 = 300, 650
    kx2, ky2 = jax.random.split(kx)
    x2 = jax.random.normal(kx2, (J2, N_FEATURES), dtype=jnp.float32)
    y2 = jax.random.normal(ky2, (K2, N_FEATURES), dtype=jnp.float32)
    out2 = mykernel(x2, y2, weight, bias)
    jax.block_until_ready(out2)
    ref2 = _reference(x2, y2, weight, bias)
    assert out2.shape == (J2, K2)
    assert jnp.allclose(out2, ref2, atol=1e-1, rtol=2e-2), float(jnp.max(jnp.abs(out2 - ref2)))

    print("KERNEL_OK")
</pallas_src>

<mosaic_0001>
module attributes {stable_mosaic.version = 11 : i64} {
  func.func @mykernel_body(%arg0: i32, %arg1: i32, %arg2: memref<8x4xf32, #tpu.memory_space<vmem>>, %arg3: memref<8x4xf32, #tpu.memory_space<vmem>>, %arg4: memref<4x20xf32, #tpu.memory_space<vmem>>, %arg5: memref<1x20xf32, #tpu.memory_space<vmem>>, %arg6: memref<8x8xf32, #tpu.memory_space<vmem>>) attributes {dimension_semantics = [#tpu.dimension_semantics<parallel>, #tpu.dimension_semantics<parallel>], iteration_bounds = array<i64: 1, 1>, scalar_prefetch = 0 : i64, scratch_operands = 0 : i64, tpu.core_type = #tpu.core_type<tc>, window_params = [{transform_indices = @transform_0, window_bounds = array<i64: 8, 4>}, {transform_indices = @transform_1, window_bounds = array<i64: 8, 4>}, {pipeline_mode = #tpu.pipeline_mode<synchronous>, transform_indices = @transform_2, window_bounds = array<i64: 4, 20>}, {pipeline_mode = #tpu.pipeline_mode<synchronous>, transform_indices = @transform_3, window_bounds = array<i64: 1, 20>}, {transform_indices = @transform_4, window_bounds = array<i64: 8, 8>}]} {
    %c0 = arith.constant 0 : index
    %c0_0 = arith.constant 0 : index
    %0 = vector.load %arg2[%c0, %c0_0] : memref<8x4xf32, #tpu.memory_space<vmem>>, vector<8x4xf32>
    %c0_1 = arith.constant 0 : index
    %c0_2 = arith.constant 0 : index
    %1 = vector.load %arg4[%c0_1, %c0_2] : memref<4x20xf32, #tpu.memory_space<vmem>>, vector<4x20xf32>
    %cst = arith.constant dense<0.000000e+00> : vector<8x20xf32>
    %2 = tpu.matmul %0, %1, %cst {dimension_numbers = #tpu.dot_dimension_numbers<[1], [0], [0], [1], [0, 0, 1, 1], [], []>} : vector<8x4xf32>, vector<4x20xf32>, vector<8x20xf32> -> vector<8x20xf32>
    %c0_3 = arith.constant 0 : index
    %c0_4 = arith.constant 0 : index
    %3 = vector.load %arg5[%c0_3, %c0_4] : memref<1x20xf32, #tpu.memory_space<vmem>>, vector<1x20xf32>
    %4 = vector.broadcast %3 : vector<1x20xf32> to vector<8x20xf32>
    %5 = arith.addf %2, %4 : vector<8x20xf32>
    %c0_5 = arith.constant 0 : index
    %c0_6 = arith.constant 0 : index
    %6 = vector.load %arg3[%c0_5, %c0_6] : memref<8x4xf32, #tpu.memory_space<vmem>>, vector<8x4xf32>
    %c0_7 = arith.constant 0 : index
    %c0_8 = arith.constant 0 : index
    %7 = vector.load %arg4[%c0_7, %c0_8] : memref<4x20xf32, #tpu.memory_space<vmem>>, vector<4x20xf32>
    %cst_9 = arith.constant dense<0.000000e+00> : vector<8x20xf32>
    %8 = tpu.matmul %6, %7, %cst_9 {dimension_numbers = #tpu.dot_dimension_numbers<[1], [0], [0], [1], [0, 0, 1, 1], [], []>} : vector<8x4xf32>, vector<4x20xf32>, vector<8x20xf32> -> vector<8x20xf32>
    %c0_10 = arith.constant 0 : index
    %c0_11 = arith.constant 0 : index
    %9 = vector.load %arg5[%c0_10, %c0_11] : memref<1x20xf32, #tpu.memory_space<vmem>>, vector<1x20xf32>
    %10 = vector.broadcast %9 : vector<1x20xf32> to vector<8x20xf32>
    %11 = arith.addf %8, %10 : vector<8x20xf32>
    %12 = arith.truncf %5 : vector<8x20xf32> to vector<8x20xbf16>
    %13 = arith.truncf %11 : vector<8x20xf32> to vector<8x20xbf16>
    %cst_12 = arith.constant dense<0.000000e+00> : vector<8x8xf32>
    %14 = tpu.matmul %12, %13, %cst_12 {dimension_numbers = #tpu.dot_dimension_numbers<[1], [1], [0], [0], [0, 0, 1, 0], [], []>} : vector<8x20xbf16>, vector<8x20xbf16>, vector<8x8xf32> -> vector<8x8xf32>
    %c0_13 = arith.constant 0 : index
    %c0_14 = arith.constant 0 : index
    %15 = vector.load %arg6[%c0_13, %c0_14] : memref<8x8xf32, #tpu.memory_space<vmem>>, vector<8x8xf32>
    tpu.vector_store %arg6[%c0_13, %c0_14], %14 {strides = array<i32>} : memref<8x8xf32, #tpu.memory_space<vmem>>, vector<8x8xf32>,
    return
  }
  func.func @transform_0(%arg0: i32, %arg1: i32) -> (i32, i32) {
    %c0_i32 = arith.constant 0 : i32
    %c0_i32_0 = arith.constant 0 : i32
    return %arg0, %c0_i32 : i32, i32
  }
  func.func @transform_1(%arg0: i32, %arg1: i32) -> (i32, i32) {
    %c0_i32 = arith.constant 0 : i32
    %c0_i32_0 = arith.constant 0 : i32
    return %arg1, %c0_i32 : i32, i32
  }
  func.func @transform_2(%arg0: i32, %arg1: i32) -> (i32, i32) {
    %c0_i32 = arith.constant 0 : i32
    %c0_i32_0 = arith.constant 0 : i32
    %c0_i32_1 = arith.constant 0 : i32
    return %c0_i32, %c0_i32_0 : i32, i32
  }
  func.func @transform_3(%arg0: i32, %arg1: i32) -> (i32, i32) {
    %c0_i32 = arith.constant 0 : i32
    %c0_i32_0 = arith.constant 0 : i32
    %c0_i32_1 = arith.constant 0 : i32
    return %c0_i32, %c0_i32_0 : i32, i32
  }
  func.func @transform_4(%arg0: i32, %arg1: i32) -> (i32, i32) {
    %c0_i32 = arith.constant 0 : i32
    return %arg0, %arg1 : i32, i32
  }
}

</mosaic_0001>

<bundles_post_ra>
// kernel: tpu_custom_call.1
= control target key start
LH: loop header
LB: loop body
LE: loop exit
PB: predicated region body
PF: predicated region fallthrough
CT: control target
= control target key end

     0   :  { %vm29_vm0 = vcmask 1043456   ;;  %vm25_vm1 = vcmask 31744   ;;  %s191_s0 = inlined_call_operand.vmem [shape: f32[8,4], index: 0, kind: input, shape index: {}]   ;;  %s192_s1 = inlined_call_operand.vmem [shape: f32[8,4], index: 1, kind: input, shape index: {}]   ;;  %s193_s2 = inlined_call_operand.vmem [shape: f32[4,20], index: 2, kind: input, shape index: {}]   ;;  %s194_s3 = inlined_call_operand.vmem [shape: f32[1,20], index: 3, kind: input, shape index: {}]   ;;  %s195_s4 = inlined_call_operand.hbm [shape: f32[8,8], index: 4, kind: output, shape index: {}]  }
   0x1   :  { %v20_v0 = vld [vmem:[%s193_s2] sm:$0xf] }
   0x2   :  { %v53_v1 = vld [vmem:[%s192_s1] sm:$0xff]  ;;  %119 = vmatpush.msk.msra.mxu1 %vm29_vm0, %v20_v0  ;;  %117 = vmatpush.msk.msra.mxu0 %vm29_vm0, %v20_v0 }
   0x3   :  { %v19_v2 = vld [vmem:[%s191_s0] sm:$0xff] }
   0x4   :  { %9 = vsyncpa [#allocation3], 0  ;;  %120 = vmatmul.msk.f32.vlgmr.msra.gmra.mxu1 %vm25_vm1, %v53_v1  ;;  %118 = vmatmul.msk.f32.vlgmr.msra.gmra.mxu0 %vm25_vm1, %v19_v2  ;;  %v123_v3 = vld [vmem:[%s194_s3] ss:$0 sm:$0xff]  ;;  %vm79_vm2 = vcmask 162816   ;;  %s150_s0 = smov [#allocation2]  }
   0x5   :  { %s106_s1 = sshll.u32 %s150_s0, 4  ;;  %s108_s24 = sshll.u32 %s195_s4, 4  ;;  %vm99_vm3 = vcmask 64512   ;;  %s107_s1 = int_to_ptr.vmem [resolvable:$true] %s106_s1  ;;  %s109_s24 = int_to_ptr.hbm [resolvable:$true] %s108_s24 }
  0x81   :  { %v74_v4 = vpop.f32.mrf.mxu1  ;;  %v50_v6 = vpop.f32.mrf.mxu0 }
  0x82   :  { %v75_v5 = vadd.f32 %v123_v3, %v74_v4  ;;  %v51_v9 = vadd.f32 %v123_v3, %v50_v6 }
  0x84   :  { %v78_v7 = vpack.c.bf16 %v75_v5, %v75_v5  ;;  %v77_v10 = vpack.c.bf16 %v51_v9, %v51_v9 }
  0x86   :  { %v84_v8 = vsel %vm79_vm2, %v78_v7, 0 }
  0x87   :  { %93 = vmatpush.bf16.xpose.msra.mxu2 %v84_v8 }
  0x8e   :  { %121 = vmatmul.msk.bf16.vlgmr.msra.gmra.mxu2 %vm79_vm2, %v77_v10 }
 0x111   :  { %v95_v11 = vpop.f32.mrf.mxu2 }
 0x112   :  { %100 = vst.msk [vmem:[#allocation2] sm:$0xff] %vm99_vm3, %v95_v11 }
 0x113   :  { %111 = dma.vmem_to_hbm [thread:$0]  %s107_s1, 128, %s109_s24, [#allocation3]  }
 0x119   :  { %v97_v12 = vpop.f32.mrf.mxu2 }
 0x11a   :  { %148 = dma.done.wait [#allocation3], 128  }
 0x11b   :  { %149 = vsyncadd [#allocation3], 4294967168 }
 0x11c   :  { %116 = vsyncpa [#allocation3], 1 }

</bundles_post_ra>
